<compile_context>
chip_gen: v5e
topology: v5e:2x2
jax: 0.10.0
libtpu: 0.0.40
codegen_flags: <defaults>
</compile_context>

<pallas_src>
import functools

import numpy as np
import jax
import jax.numpy as jnp
from jax.experimental import pallas as pl
from jax.experimental.pallas import tpu as pltpu

_LANE = 128


def _round_up(x, m):
    return (x + m - 1) // m * m


def _sublane_multiple(itemsize):
    # sub-32-bit dtypes pack along sublanes: 8 rows for 4B, 16 for 2B, 32 for 1B.
    return {4: 8, 2: 16, 1: 32}.get(int(itemsize), 8)


def _vmem_budget_bytes():
    """Per-generation scoped-VMEM budget: ~3/4 of physical VMEM, capped at 96 MiB.

    v5e/v6e (128 MiB physical) -> 96 MiB, v7x (64 MiB physical) -> 48 MiB.
    Falls back to 48 MiB (safe on every generation) if the query is unavailable.
    """
    try:
        cap = int(getattr(pltpu.get_tpu_info(), "vmem_capacity_bytes", 64 << 20))
    except Exception:  # query unavailable -> conservative default
        cap = 64 << 20
    return int(max(32 << 20, min(96 << 20, (cap * 3) // 4)))


# --------------------------- kernel bodies ---------------------------


def _rescal_kernel_blocked(head_ref, rel_ref, tail_ref, out_ref):
    """Path for D % 128 == 0: rel block is (tile_e, R, D); D already lane-dense."""
    # tmp[e, i] = sum_j rel[e, i, j] * tail[e, j]   (product in input dtype, f32 accumulation)
    tmp = jnp.sum(rel_ref[...] * tail_ref[...], axis=-1, dtype=jnp.float32)       # (tE, R)
    score = jnp.sum(head_ref[...].astype(jnp.float32) * tmp, axis=-1, keepdims=True)
    out_ref[...] = score.astype(out_ref.dtype)


def _rescal_kernel_flat(head_ref, rel_ref, tail_ref, out_ref, *, R, D):
    """Path for D % 128 != 0: rel streamed as a contiguous lane-dense (tile_e, R*D) block.

        score[e] = sum_j tail[e, j] * u[e, j],
        u[e, j]  = sum_i head[e, i] * rel[e, i*D + j]

    Each relation row i is a static, contiguous D-lane slice of the lane-dense block;
    the slice extraction (XLU) and the FMAs (VPU) are cheap relative to the rel HBM
    stream, so the kernel stays at the DMA roofline. Exact f32 accumulation throughout.
    """
    head = head_ref[...].astype(jnp.float32)                                       # (tE, R)
    u = rel_ref[:, 0:D].astype(jnp.float32) * head[:, 0:1]                         # (tE, D) f32
    for i in range(1, R):
        u = u + rel_ref[:, i * D:(i + 1) * D].astype(jnp.float32) * head[:, i:i + 1]
    score = jnp.sum(u * tail_ref[...].astype(jnp.float32), axis=-1, keepdims=True)
    out_ref[...] = score.astype(out_ref.dtype)


# --------------------------- wrapper ---------------------------


def rescal_edge_score(head_emb, rel_emb, tail_emb, *, relation_dim, entity_dim,
                      tile_e=None, target_block_bytes=None, vmem_limit_bytes=None):
    """Pallas implementation of RESCALScore.edge_func.

    head_emb: (E, D), rel_emb: (E, R*D), tail_emb: (E, D)  ->  (E,) float32 scores.
    """
    E, D = head_emb.shape
    R = int(relation_dim)
    assert D == int(entity_dim)
    assert rel_emb.shape == (E, R * D)
    assert tail_emb.shape == (E, D)
    # The torch code does `head * matmul(rel, tail)` which only broadcasts if R == D.
    assert R == D, "RESCAL edge_func requires relation_dim == entity_dim"

    itemsize = int(jnp.dtype(rel_emb.dtype).itemsize)
    sub = _sublane_multiple(itemsize)

    if vmem_limit_bytes is None:
        vmem_limit_bytes = _vmem_budget_bytes()
    if target_block_bytes is None:
        # ~8 MiB rel per grid step keeps the ~0.35us per-step pipeline overhead below
        # ~5-10% of the HBM stream time on v5e/v6e/v7x; use 16 MiB when VMEM allows.
        target_block_bytes = (16 << 20) if vmem_limit_bytes >= (80 << 20) else (8 << 20)

    # Path selection:
    #   * D % 128 == 0 -> 3-D (tile_e, R, D) block: D lands exactly on lanes, no padding.
    #   * otherwise    -> 2-D lane-dense (tile_e, R*D) block: the HBM->VMEM copy stays one
    #     contiguous burst (no short strided writes, no lane-pad VMEM inflation).
    flat_path = (D % _LANE != 0)

    # ---- tile sizing from the PADDED VMEM footprint (what actually lands in VMEM) ----
    head_pad = _round_up(D, _LANE) * itemsize                      # per-edge head/tail rows
    if flat_path:
        rel_pad = _round_up(R * D, _LANE) * itemsize
        temps = 6 * _round_up(D, _LANE) * 4                        # u / slice / product (f32)
    else:
        rel_pad = _round_up(R, sub) * _round_up(D, _LANE) * itemsize
        temps = 3 * _round_up(R, sub) * _round_up(D, _LANE) * 4    # rel*tail product (+slack)
    per_edge = 2 * (rel_pad + 2 * head_pad) + temps + _round_up(R, _LANE) * 4 + 2 * 4
    fixed = 2 << 20                                                # out blocks, misc slack

    if tile_e is None:
        budget = max(vmem_limit_bytes - fixed, per_edge * sub)
        tile_e = min(budget // per_edge, max(target_block_bytes // rel_pad, sub))
    tile_e = int(max((int(tile_e) // sub) * sub, sub))
    tile_e = min(tile_e, _round_up(E, sub))
    tile_e = max(tile_e, sub)

    # Ragged E: no jnp.pad copy of the dominant rel tensor. The grid simply over-runs;
    # out-of-bounds rows of the last block hold garbage, produce garbage scores, and
    # their writeback is dropped by Pallas (never observed by the caller).
    grid = (pl.cdiv(E, tile_e),)

    cost = pl.CostEstimate(
        flops=2 * E * R * D + 2 * E * R,
        transcendentals=0,
        bytes_accessed=E * (R * D + 2 * D) * itemsize + E * 4,
    )
    cparams = pltpu.CompilerParams(
        # Independent edges: megacore-shardable on multi-TC parts.
        dimension_semantics=("parallel",),
        vmem_limit_bytes=int(vmem_limit_bytes),
    )

    # Output stays (tile_e, 1): output bytes are O(E) vs O(E*R*D) input bytes, so a
    # lane-dense output repack would not move the roofline for this kernel.
    out_shape = jax.ShapeDtypeStruct((E, 1), jnp.float32)          # keep scores in f32
    out_spec = pl.BlockSpec((tile_e, 1), lambda i: (i, 0))

    if flat_path:
        kernel = functools.partial(_rescal_kernel_flat, R=R, D=D)
        in_specs = [
            pl.BlockSpec((tile_e, D), lambda i: (i, 0)),
            pl.BlockSpec((tile_e, R * D), lambda i: (i, 0)),       # contiguous lane-dense DMA
            pl.BlockSpec((tile_e, D), lambda i: (i, 0)),
        ]
        operands = (head_emb, rel_emb, tail_emb)
    else:
        kernel = _rescal_kernel_blocked
        in_specs = [
            pl.BlockSpec((tile_e, D), lambda i: (i, 0)),
            pl.BlockSpec((tile_e, R, D), lambda i: (i, 0, 0)),
            pl.BlockSpec((tile_e, 1, D), lambda i: (i, 0, 0)),
        ]
        # Row-major-preserving reshapes, free at the XLA level (no data movement).
        operands = (head_emb, rel_emb.reshape(E, R, D), tail_emb.reshape(E, 1, D))

    out = pl.pallas_call(
        kernel,
        out_shape=out_shape,
        grid_spec=pl.GridSpec(grid=grid, in_specs=in_specs, out_specs=out_spec),
        compiler_params=cparams,
        cost_estimate=cost,
    )(*operands)
    return out[:, 0]


def rescal_edge_score_ref(head_emb, rel_emb, tail_emb, *, relation_dim, entity_dim):
    """Pure-JAX reference mirroring the PyTorch edge_func (full f32 precision)."""
    rel3 = rel_emb.reshape(-1, relation_dim, entity_dim).astype(jnp.float32)
    tmp = jnp.einsum('erd,ed->er', rel3, tail_emb.astype(jnp.float32),
                     precision=jax.lax.Precision.HIGHEST)
    return jnp.sum(head_emb.astype(jnp.float32) * tmp, axis=-1)


if __name__ == "__main__":
    key = jax.random.PRNGKey(0)

    def _run_case(case_key, E, dim, tile_e=None):
        k1, k2, k3 = jax.random.split(case_key, 3)
        head = jax.random.normal(k1, (E, dim), dtype=jnp.float32)
        tail = jax.random.normal(k2, (E, dim), dtype=jnp.float32)
        rel = jax.random.normal(k3, (E, dim * dim), dtype=jnp.float32)
        out = jax.block_until_ready(
            rescal_edge_score(head, rel, tail, relation_dim=dim, entity_dim=dim,
                              tile_e=tile_e))
        ref = rescal_edge_score_ref(head, rel, tail, relation_dim=dim, entity_dim=dim)
        np.testing.assert_allclose(np.asarray(out), np.asarray(ref),
                                   rtol=1e-4, atol=1e-3)

    k1, k2, k3, k4 = jax.random.split(key, 4)
    # lane-dense path (D % 128 != 0), E divisible by the tile (multi-tile)
    _run_case(k1, E=16, dim=32, tile_e=8)
    # lane-dense path, ragged E (partial last block, masked writeback)
    _run_case(k2, E=13, dim=32, tile_e=8)
    # lane-dense path, auto tile sizing (single partial block)
    _run_case(k3, E=12, dim=32)
    # blocked path (D % 128 == 0), ragged E
    _run_case(k4, E=10, dim=128, tile_e=8)

    print("KERNEL_OK")
</pallas_src>

<mosaic_0001>
module attributes {stable_mosaic.version = 11 : i64} {
  func.func @_rescal_kernel_flat(%arg0: i32, %arg1: memref<8x32xf32, #tpu.memory_space<vmem>>, %arg2: memref<8x1024xf32, #tpu.memory_space<vmem>>, %arg3: memref<8x32xf32, #tpu.memory_space<vmem>>, %arg4: memref<8x1xf32, #tpu.memory_space<vmem>>) attributes {dimension_semantics = [#tpu.dimension_semantics<parallel>], iteration_bounds = array<i64: 2>, scalar_prefetch = 0 : i64, scratch_operands = 0 : i64, tpu.core_type = #tpu.core_type<tc>, window_params = [{transform_indices = @transform_0, window_bounds = array<i64: 8, 32>}, {transform_indices = @transform_1, window_bounds = array<i64: 8, 1024>}, {transform_indices = @transform_2, window_bounds = array<i64: 8, 32>}, {transform_indices = @transform_3, window_bounds = array<i64: 8, 1>}]} {
    %c0 = arith.constant 0 : index
    %c0_0 = arith.constant 0 : index
    %0 = vector.load %arg1[%c0, %c0_0] : memref<8x32xf32, #tpu.memory_space<vmem>>, vector<8x32xf32>
    %c0_1 = arith.constant 0 : index
    %c0_2 = arith.constant 0 : index
    %1 = vector.load %arg2[%c0_1, %c0_2] : memref<8x1024xf32, #tpu.memory_space<vmem>>, vector<8x32xf32>
    %2 = vector.extract_strided_slice %0 {offsets = [0, 0], sizes = [8, 1], strides = [1, 1]} : vector<8x32xf32> to vector<8x1xf32>
    %3 = vector.broadcast %2 : vector<8x1xf32> to vector<8x32xf32>
    %4 = arith.mulf %1, %3 : vector<8x32xf32>
    %c0_3 = arith.constant 0 : index
    %c32 = arith.constant 32 : index
    %5 = vector.load %arg2[%c0_3, %c32] : memref<8x1024xf32, #tpu.memory_space<vmem>>, vector<8x32xf32>
    %6 = vector.extract_strided_slice %0 {offsets = [0, 1], sizes = [8, 1], strides = [1, 1]} : vector<8x32xf32> to vector<8x1xf32>
    %7 = vector.broadcast %6 : vector<8x1xf32> to vector<8x32xf32>
    %8 = arith.mulf %5, %7 : vector<8x32xf32>
    %9 = arith.addf %4, %8 : vector<8x32xf32>
    %c0_4 = arith.constant 0 : index
    %c64 = arith.constant 64 : index
    %10 = vector.load %arg2[%c0_4, %c64] : memref<8x1024xf32, #tpu.memory_space<vmem>>, vector<8x32xf32>
    %11 = vector.extract_strided_slice %0 {offsets = [0, 2], sizes = [8, 1], strides = [1, 1]} : vector<8x32xf32> to vector<8x1xf32>
    %12 = vector.broadcast %11 : vector<8x1xf32> to vector<8x32xf32>
    %13 = arith.mulf %10, %12 : vector<8x32xf32>
    %14 = arith.addf %9, %13 : vector<8x32xf32>
    %c0_5 = arith.constant 0 : index
    %c96 = arith.constant 96 : index
    %15 = vector.load %arg2[%c0_5, %c96] : memref<8x1024xf32, #tpu.memory_space<vmem>>, vector<8x32xf32>
    %16 = vector.extract_strided_slice %0 {offsets = [0, 3], sizes = [8, 1], strides = [1, 1]} : vector<8x32xf32> to vector<8x1xf32>
    %17 = vector.broadcast %16 : vector<8x1xf32> to vector<8x32xf32>
    %18 = arith.mulf %15, %17 : vector<8x32xf32>
    %19 = arith.addf %14, %18 : vector<8x32xf32>
    %c0_6 = arith.constant 0 : index
    %c128 = arith.constant 128 : index
    %20 = vector.load %arg2[%c0_6, %c128] : memref<8x1024xf32, #tpu.memory_space<vmem>>, vector<8x32xf32>
    %21 = vector.extract_strided_slice %0 {offsets = [0, 4], sizes = [8, 1], strides = [1, 1]} : vector<8x32xf32> to vector<8x1xf32>
    %22 = vector.broadcast %21 : vector<8x1xf32> to vector<8x32xf32>
    %23 = arith.mulf %20, %22 : vector<8x32xf32>
    %24 = arith.addf %19, %23 : vector<8x32xf32>
    %c0_7 = arith.constant 0 : index
    %c160 = arith.constant 160 : index
    %25 = vector.load %arg2[%c0_7, %c160] : memref<8x1024xf32, #tpu.memory_space<vmem>>, vector<8x32xf32>
    %26 = vector.extract_strided_slice %0 {offsets = [0, 5], sizes = [8, 1], strides = [1, 1]} : vector<8x32xf32> to vector<8x1xf32>
    %27 = vector.broadcast %26 : vector<8x1xf32> to vector<8x32xf32>
    %28 = arith.mulf %25, %27 : vector<8x32xf32>
    %29 = arith.addf %24, %28 : vector<8x32xf32>
    %c0_8 = arith.constant 0 : index
    %c192 = arith.constant 192 : index
    %30 = vector.load %arg2[%c0_8, %c192] : memref<8x1024xf32, #tpu.memory_space<vmem>>, vector<8x32xf32>
    %31 = vector.extract_strided_slice %0 {offsets = [0, 6], sizes = [8, 1], strides = [1, 1]} : vector<8x32xf32> to vector<8x1xf32>
    %32 = vector.broadcast %31 : vector<8x1xf32> to vector<8x32xf32>
    %33 = arith.mulf %30, %32 : vector<8x32xf32>
    %34 = arith.addf %29, %33 : vector<8x32xf32>
    %c0_9 = arith.constant 0 : index
    %c224 = arith.constant 224 : index
    %35 = vector.load %arg2[%c0_9, %c224] : memref<8x1024xf32, #tpu.memory_space<vmem>>, vector<8x32xf32>
    %36 = vector.extract_strided_slice %0 {offsets = [0, 7], sizes = [8, 1], strides = [1, 1]} : vector<8x32xf32> to vector<8x1xf32>
    %37 = vector.broadcast %36 : vector<8x1xf32> to vector<8x32xf32>
    %38 = arith.mulf %35, %37 : vector<8x32xf32>
    %39 = arith.addf %34, %38 : vector<8x32xf32>
    %c0_10 = arith.constant 0 : index
    %c256 = arith.constant 256 : index
    %40 = vector.load %arg2[%c0_10, %c256] : memref<8x1024xf32, #tpu.memory_space<vmem>>, vector<8x32xf32>
    %41 = vector.extract_strided_slice %0 {offsets = [0, 8], sizes = [8, 1], strides = [1, 1]} : vector<8x32xf32> to vector<8x1xf32>
    %42 = vector.broadcast %41 : vector<8x1xf32> to vector<8x32xf32>
    %43 = arith.mulf %40, %42 : vector<8x32xf32>
    %44 = arith.addf %39, %43 : vector<8x32xf32>
    %c0_11 = arith.constant 0 : index
    %c288 = arith.constant 288 : index
    %45 = vector.load %arg2[%c0_11, %c288] : memref<8x1024xf32, #tpu.memory_space<vmem>>, vector<8x32xf32>
    %46 = vector.extract_strided_slice %0 {offsets = [0, 9], sizes = [8, 1], strides = [1, 1]} : vector<8x32xf32> to vector<8x1xf32>
    %47 = vector.broadcast %46 : vector<8x1xf32> to vector<8x32xf32>
    %48 = arith.mulf %45, %47 : vector<8x32xf32>
    %49 = arith.addf %44, %48 : vector<8x32xf32>
    %c0_12 = arith.constant 0 : index
    %c320 = arith.constant 320 : index
    %50 = vector.load %arg2[%c0_12, %c320] : memref<8x1024xf32, #tpu.memory_space<vmem>>, vector<8x32xf32>
    %51 = vector.extract_strided_slice %0 {offsets = [0, 10], sizes = [8, 1], strides = [1, 1]} : vector<8x32xf32> to vector<8x1xf32>
    %52 = vector.broadcast %51 : vector<8x1xf32> to vector<8x32xf32>
    %53 = arith.mulf %50, %52 : vector<8x32xf32>
    %54 = arith.addf %49, %53 : vector<8x32xf32>
    %c0_13 = arith.constant 0 : index
    %c352 = arith.constant 352 : index
    %55 = vector.load %arg2[%c0_13, %c352] : memref<8x1024xf32, #tpu.memory_space<vmem>>, vector<8x32xf32>
    %56 = vector.extract_strided_slice %0 {offsets = [0, 11], sizes = [8, 1], strides = [1, 1]} : vector<8x32xf32> to vector<8x1xf32>
    %57 = vector.broadcast %56 : vector<8x1xf32> to vector<8x32xf32>
    %58 = arith.mulf %55, %57 : vector<8x32xf32>
    %59 = arith.addf %54, %58 : vector<8x32xf32>
    %c0_14 = arith.constant 0 : index
    %c384 = arith.constant 384 : index
    %60 = vector.load %arg2[%c0_14, %c384] : memref<8x1024xf32, #tpu.memory_space<vmem>>, vector<8x32xf32>
    %61 = vector.extract_strided_slice %0 {offsets = [0, 12], sizes = [8, 1], strides = [1, 1]} : vector<8x32xf32> to vector<8x1xf32>
    %62 = vector.broadcast %61 : vector<8x1xf32> to vector<8x32xf32>
    %63 = arith.mulf %60, %62 : vector<8x32xf32>
    %64 = arith.addf %59, %63 : vector<8x32xf32>
    %c0_15 = arith.constant 0 : index
    %c416 = arith.constant 416 : index
    %65 = vector.load %arg2[%c0_15, %c416] : memref<8x1024xf32, #tpu.memory_space<vmem>>, vector<8x32xf32>
    %66 = vector.extract_strided_slice %0 {offsets = [0, 13], sizes = [8, 1], strides = [1, 1]} : vector<8x32xf32> to vector<8x1xf32>
    %67 = vector.broadcast %66 : vector<8x1xf32> to vector<8x32xf32>
    %68 = arith.mulf %65, %67 : vector<8x32xf32>
    %69 = arith.addf %64, %68 : vector<8x32xf32>
    %c0_16 = arith.constant 0 : index
    %c448 = arith.constant 448 : index
    %70 = vector.load %arg2[%c0_16, %c448] : memref<8x1024xf32, #tpu.memory_space<vmem>>, vector<8x32xf32>
    %71 = vector.extract_strided_slice %0 {offsets = [0, 14], sizes = [8, 1], strides = [1, 1]} : vector<8x32xf32> to vector<8x1xf32>
    %72 = vector.broadcast %71 : vector<8x1xf32> to vector<8x32xf32>
    %73 = arith.mulf %70, %72 : vector<8x32xf32>
    %74 = arith.addf %69, %73 : vector<8x32xf32>
    %c0_17 = arith.constant 0 : index
    %c480 = arith.constant 480 : index
    %75 = vector.load %arg2[%c0_17, %c480] : memref<8x1024xf32, #tpu.memory_space<vmem>>, vector<8x32xf32>
    %76 = vector.extract_strided_slice %0 {offsets = [0, 15], sizes = [8, 1], strides = [1, 1]} : vector<8x32xf32> to vector<8x1xf32>
    %77 = vector.broadcast %76 : vector<8x1xf32> to vector<8x32xf32>
    %78 = arith.mulf %75, %77 : vector<8x32xf32>
    %79 = arith.addf %74, %78 : vector<8x32xf32>
    %c0_18 = arith.constant 0 : index
    %c512 = arith.constant 512 : index
    %80 = vector.load %arg2[%c0_18, %c512] : memref<8x1024xf32, #tpu.memory_space<vmem>>, vector<8x32xf32>
    %81 = vector.extract_strided_slice %0 {offsets = [0, 16], sizes = [8, 1], strides = [1, 1]} : vector<8x32xf32> to vector<8x1xf32>
    %82 = vector.broadcast %81 : vector<8x1xf32> to vector<8x32xf32>
    %83 = arith.mulf %80, %82 : vector<8x32xf32>
    %84 = arith.addf %79, %83 : vector<8x32xf32>
    %c0_19 = arith.constant 0 : index
    %c544 = arith.constant 544 : index
    %85 = vector.load %arg2[%c0_19, %c544] : memref<8x1024xf32, #tpu.memory_space<vmem>>, vector<8x32xf32>
    %86 = vector.extract_strided_slice %0 {offsets = [0, 17], sizes = [8, 1], strides = [1, 1]} : vector<8x32xf32> to vector<8x1xf32>
    %87 = vector.broadcast %86 : vector<8x1xf32> to vector<8x32xf32>
    %88 = arith.mulf %85, %87 : vector<8x32xf32>
    %89 = arith.addf %84, %88 : vector<8x32xf32>
    %c0_20 = arith.constant 0 : index
    %c576 = arith.constant 576 : index
    %90 = vector.load %arg2[%c0_20, %c576] : memref<8x1024xf32, #tpu.memory_space<vmem>>, vector<8x32xf32>
    %91 = vector.extract_strided_slice %0 {offsets = [0, 18], sizes = [8, 1], strides = [1, 1]} : vector<8x32xf32> to vector<8x1xf32>
    %92 = vector.broadcast %91 : vector<8x1xf32> to vector<8x32xf32>
    %93 = arith.mulf %90, %92 : vector<8x32xf32>
    %94 = arith.addf %89, %93 : vector<8x32xf32>
    %c0_21 = arith.constant 0 : index
    %c608 = arith.constant 608 : index
    %95 = vector.load %arg2[%c0_21, %c608] : memref<8x1024xf32, #tpu.memory_space<vmem>>, vector<8x32xf32>
    %96 = vector.extract_strided_slice %0 {offsets = [0, 19], sizes = [8, 1], strides = [1, 1]} : vector<8x32xf32> to vector<8x1xf32>
    %97 = vector.broadcast %96 : vector<8x1xf32> to vector<8x32xf32>
    %98 = arith.mulf %95, %97 : vector<8x32xf32>
    %99 = arith.addf %94, %98 : vector<8x32xf32>
    %c0_22 = arith.constant 0 : index
    %c640 = arith.constant 640 : index
    %100 = vector.load %arg2[%c0_22, %c640] : memref<8x1024xf32, #tpu.memory_space<vmem>>, vector<8x32xf32>
    %101 = vector.extract_strided_slice %0 {offsets = [0, 20], sizes = [8, 1], strides = [1, 1]} : vector<8x32xf32> to vector<8x1xf32>
    %102 = vector.broadcast %101 : vector<8x1xf32> to vector<8x32xf32>
    %103 = arith.mulf %100, %102 : vector<8x32xf32>
    %104 = arith.addf %99, %103 : vector<8x32xf32>
    %c0_23 = arith.constant 0 : index
    %c672 = arith.constant 672 : index
    %105 = vector.load %arg2[%c0_23, %c672] : memref<8x1024xf32, #tpu.memory_space<vmem>>, vector<8x32xf32>
    %106 = vector.extract_strided_slice %0 {offsets = [0, 21], sizes = [8, 1], strides = [1, 1]} : vector<8x32xf32> to vector<8x1xf32>
    %107 = vector.broadcast %106 : vector<8x1xf32> to vector<8x32xf32>
    %108 = arith.mulf %105, %107 : vector<8x32xf32>
    %109 = arith.addf %104, %108 : vector<8x32xf32>
    %c0_24 = arith.constant 0 : index
    %c704 = arith.constant 704 : index
    %110 = vector.load %arg2[%c0_24, %c704] : memref<8x1024xf32, #tpu.memory_space<vmem>>, vector<8x32xf32>
    %111 = vector.extract_strided_slice %0 {offsets = [0, 22], sizes = [8, 1], strides = [1, 1]} : vector<8x32xf32> to vector<8x1xf32>
    %112 = vector.broadcast %111 : vector<8x1xf32> to vector<8x32xf32>
    %113 = arith.mulf %110, %112 : vector<8x32xf32>
    %114 = arith.addf %109, %113 : vector<8x32xf32>
    %c0_25 = arith.constant 0 : index
    %c736 = arith.constant 736 : index
    %115 = vector.load %arg2[%c0_25, %c736] : memref<8x1024xf32, #tpu.memory_space<vmem>>, vector<8x32xf32>
    %116 = vector.extract_strided_slice %0 {offsets = [0, 23], sizes = [8, 1], strides = [1, 1]} : vector<8x32xf32> to vector<8x1xf32>
    %117 = vector.broadcast %116 : vector<8x1xf32> to vector<8x32xf32>
    %118 = arith.mulf %115, %117 : vector<8x32xf32>
    %119 = arith.addf %114, %118 : vector<8x32xf32>
    %c0_26 = arith.constant 0 : index
    %c768 = arith.constant 768 : index
    %120 = vector.load %arg2[%c0_26, %c768] : memref<8x1024xf32, #tpu.memory_space<vmem>>, vector<8x32xf32>
    %121 = vector.extract_strided_slice %0 {offsets = [0, 24], sizes = [8, 1], strides = [1, 1]} : vector<8x32xf32> to vector<8x1xf32>
    %122 = vector.broadcast %121 : vector<8x1xf32> to vector<8x32xf32>
    %123 = arith.mulf %120, %122 : vector<8x32xf32>
    %124 = arith.addf %119, %123 : vector<8x32xf32>
    %c0_27 = arith.constant 0 : index
    %c800 = arith.constant 800 : index
    %125 = vector.load %arg2[%c0_27, %c800] : memref<8x1024xf32, #tpu.memory_space<vmem>>, vector<8x32xf32>
    %126 = vector.extract_strided_slice %0 {offsets = [0, 25], sizes = [8, 1], strides = [1, 1]} : vector<8x32xf32> to vector<8x1xf32>
    %127 = vector.broadcast %126 : vector<8x1xf32> to vector<8x32xf32>
    %128 = arith.mulf %125, %127 : vector<8x32xf32>
    %129 = arith.addf %124, %128 : vector<8x32xf32>
    %c0_28 = arith.constant 0 : index
    %c832 = arith.constant 832 : index
    %130 = vector.load %arg2[%c0_28, %c832] : memref<8x1024xf32, #tpu.memory_space<vmem>>, vector<8x32xf32>
    %131 = vector.extract_strided_slice %0 {offsets = [0, 26], sizes = [8, 1], strides = [1, 1]} : vector<8x32xf32> to vector<8x1xf32>
    %132 = vector.broadcast %131 : vector<8x1xf32> to vector<8x32xf32>
    %133 = arith.mulf %130, %132 : vector<8x32xf32>
    %134 = arith.addf %129, %133 : vector<8x32xf32>
    %c0_29 = arith.constant 0 : index
    %c864 = arith.constant 864 : index
    %135 = vector.load %arg2[%c0_29, %c864] : memref<8x1024xf32, #tpu.memory_space<vmem>>, vector<8x32xf32>
    %136 = vector.extract_strided_slice %0 {offsets = [0, 27], sizes = [8, 1], strides = [1, 1]} : vector<8x32xf32> to vector<8x1xf32>
    %137 = vector.broadcast %136 : vector<8x1xf32> to vector<8x32xf32>
    %138 = arith.mulf %135, %137 : vector<8x32xf32>
    %139 = arith.addf %134, %138 : vector<8x32xf32>
    %c0_30 = arith.constant 0 : index
    %c896 = arith.constant 896 : index
    %140 = vector.load %arg2[%c0_30, %c896] : memref<8x1024xf32, #tpu.memory_space<vmem>>, vector<8x32xf32>
    %141 = vector.extract_strided_slice %0 {offsets = [0, 28], sizes = [8, 1], strides = [1, 1]} : vector<8x32xf32> to vector<8x1xf32>
    %142 = vector.broadcast %141 : vector<8x1xf32> to vector<8x32xf32>
    %143 = arith.mulf %140, %142 : vector<8x32xf32>
    %144 = arith.addf %139, %143 : vector<8x32xf32>
    %c0_31 = arith.constant 0 : index
    %c928 = arith.constant 928 : index
    %145 = vector.load %arg2[%c0_31, %c928] : memref<8x1024xf32, #tpu.memory_space<vmem>>, vector<8x32xf32>
    %146 = vector.extract_strided_slice %0 {offsets = [0, 29], sizes = [8, 1], strides = [1, 1]} : vector<8x32xf32> to vector<8x1xf32>
    %147 = vector.broadcast %146 : vector<8x1xf32> to vector<8x32xf32>
    %148 = arith.mulf %145, %147 : vector<8x32xf32>
    %149 = arith.addf %144, %148 : vector<8x32xf32>
    %c0_32 = arith.constant 0 : index
    %c960 = arith.constant 960 : index
    %150 = vector.load %arg2[%c0_32, %c960] : memref<8x1024xf32, #tpu.memory_space<vmem>>, vector<8x32xf32>
    %151 = vector.extract_strided_slice %0 {offsets = [0, 30], sizes = [8, 1], strides = [1, 1]} : vector<8x32xf32> to vector<8x1xf32>
    %152 = vector.broadcast %151 : vector<8x1xf32> to vector<8x32xf32>
    %153 = arith.mulf %150, %152 : vector<8x32xf32>
    %154 = arith.addf %149, %153 : vector<8x32xf32>
    %c0_33 = arith.constant 0 : index
    %c992 = arith.constant 992 : index
    %155 = vector.load %arg2[%c0_33, %c992] : memref<8x1024xf32, #tpu.memory_space<vmem>>, vector<8x32xf32>
    %156 = vector.extract_strided_slice %0 {offsets = [0, 31], sizes = [8, 1], strides = [1, 1]} : vector<8x32xf32> to vector<8x1xf32>
    %157 = vector.broadcast %156 : vector<8x1xf32> to vector<8x32xf32>
    %158 = arith.mulf %155, %157 : vector<8x32xf32>
    %159 = arith.addf %154, %158 : vector<8x32xf32>
    %c0_34 = arith.constant 0 : index
    %c0_35 = arith.constant 0 : index
    %160 = vector.load %arg3[%c0_34, %c0_35] : memref<8x32xf32, #tpu.memory_space<vmem>>, vector<8x32xf32>
    %161 = arith.mulf %159, %160 : vector<8x32xf32>
    %cst = arith.constant dense<0.000000e+00> : vector<8xf32>
    %162 = vector.multi_reduction <add>, %161, %cst [1] : vector<8x32xf32> to vector<8xf32>
    %163 = vector.shape_cast %162 : vector<8xf32> to vector<8x1xf32>
    %c0_36 = arith.constant 0 : index
    %c0_37 = arith.constant 0 : index
    %164 = vector.load %arg4[%c0_36, %c0_37] : memref<8x1xf32, #tpu.memory_space<vmem>>, vector<8x1xf32>
    tpu.vector_store %arg4[%c0_36, %c0_37], %163 {strides = array<i32>} : memref<8x1xf32, #tpu.memory_space<vmem>>, vector<8x1xf32>,
    return
  }
  func.func @transform_0(%arg0: i32) -> (i32, i32) {
    %c0_i32 = arith.constant 0 : i32
    %c0_i32_0 = arith.constant 0 : i32
    return %arg0, %c0_i32 : i32, i32
  }
  func.func @transform_1(%arg0: i32) -> (i32, i32) {
    %c0_i32 = arith.constant 0 : i32
    %c0_i32_0 = arith.constant 0 : i32
    return %arg0, %c0_i32 : i32, i32
  }
  func.func @transform_2(%arg0: i32) -> (i32, i32) {
    %c0_i32 = arith.constant 0 : i32
    %c0_i32_0 = arith.constant 0 : i32
    return %arg0, %c0_i32 : i32, i32
  }
  func.func @transform_3(%arg0: i32) -> (i32, i32) {
    %c0_i32 = arith.constant 0 : i32
    %c0_i32_0 = arith.constant 0 : i32
    return %arg0, %c0_i32 : i32, i32
  }
}

</mosaic_0001>

<bundles_post_ra>
// kernel: tpu_custom_call.1
= control target key start
LH: loop header
LB: loop body
LE: loop exit
PB: predicated region body
PF: predicated region fallthrough
CT: control target
= control target key end

     0   :  { %8 = vsyncpa [#allocation3], 0  ;;  %s1253_s0 = inlined_call_operand.hbm [shape: f32[16,32], index: 0, kind: input, shape index: {}]   ;;  %s1254_s1 = inlined_call_operand.hbm [shape: f32[16,1024], index: 1, kind: input, shape index: {}]   ;;  %s1255_s2 = inlined_call_operand.hbm [shape: f32[16,32], index: 2, kind: input, shape index: {}]   ;;  %s1256_s3 = inlined_call_operand.vmem [shape: f32[16,1], index: 3, kind: output, shape index: {}]  }
   0x1   :  { %10 = vsyncpa [#allocation3 + $0x1], 0 }
   0x2   :  { %11 = vsyncpa [#allocation5], 0 }
   0x3   :  { %13 = vsyncpa [#allocation5 + $0x1], 0  ;;  %s997_s12 = smov 0   ;;  %s999_s13 = smov 0  }
   0x4   :  { %s1001_s14 = smov 0   ;;  %s1003_s15 = smov 0  }
   0x5 LB: > { %s1016_s16 = sadd.s32 4294967295, %s940_s15   ;;  %s1019_s17 = sadd.s32 1, %s940_s15   ;;  %s940_s15 = sphi %s1003_s15, %s1263_s15   ;;  %s936_s14 = sphi %s1001_s14, %s1262_s14   ;;  %s932_s13 = sphi %s999_s13, %s1261_s13   ;;  %s928_s12 = sphi %s997_s12, %s1260_s12  }
   0x6   : > { %s23_s18 = ssub.s32 %s940_s15, %s1019_s17  ;;  %s26_s19 = sadd.s32 1, %s936_s14 }
   0x7   : > { %p24_p0 = scmp.eq.s32.totalorder %s23_s18, 0  ;;  %p33_p1 = scmp.ne.s32.totalorder %s936_s14, %s932_s13 }
   0x8   : > { %p34_p2 = scmp.eq.s32.totalorder %s940_s15, 0  ;;  %p39_p3 = scmp.ne.s32.totalorder %s932_s13, %s928_s12 }
   0x9   : > { %s1029_s20 = scalar_select %p24_p0, %s936_s14, %s26_s19  }
   0xa   : > { %p35_p4 = por %p34_p2, %p33_p1  ;;  %p40_p5 = scmp.eq.s32.totalorder %s1016_s16, 0 }
   0xb   : > { %p711_p6 = scmp.lt.s32.totalorder %s940_s15, 2  ;;  %s1038_s22 = sand.u32 1, %s936_s14  }
   0xc   : > { %p1033_p7 = por %p40_p5, %p39_p3  ;;  %s160_s24 = sand.u32 1, %s940_s15  }
   0xd   : > { %p1040_p8 = pnand %p711_p6, %p35_p4  ;;  %s682_s25 = sshll.u32 %s1038_s22, 6 }
   0xe   : > { %s694_s26 = sshll.u32 %s940_s15, 6  ;;  %s164_s27 = scalar_lea.vmem [#allocation4], %s682_s25 }
   0xf   : > { %s173_s28 = sshll.u32 %s164_s27, 4  ;;  %s169_s4 = scalar_lea.hbm %s1254_s1, %s694_s26  ;;  %s174_s28 = int_to_ptr.vmem [resolvable:$true] %s173_s28 }
  0x10   : > { %s171_s5 = sshll.u32 %s169_s4, 4  ;;  %p687_p9 = scmp.ge.s32.totalorder %s940_s15, 1  ;;  %s172_s5 = int_to_ptr.hbm [resolvable:$true] %s171_s5 }
  0x11   : > { %p197_p10 = scmp.lt.s32.totalorder %s940_s15, 3  ;;  %s1052_s6 = scalar_lea.sflag [#allocation5], %s160_s24 }
  0x12   : > { %s812_s7 = sshra.s32 %s172_s5, 4  ;;  %p816_p12 = pneg %p1040_p8  ;;  %s813_s7 = int_to_ptr.hbm [resolvable:$true] %s812_s7 }
  0x13   : > { %s814_s8 = scalar_lea.hbm %s813_s7, 64  ;;  %s819_s11 = scalar_lea.hbm %s1254_s1, 128 }
  0x14   : > { %p815_p11 = scmp.ne.s32.totalorder %s813_s7, %s814_s8  ;;  %p820_p1 = scmp.lt.s32.totalorder %s813_s7, %s1254_s1 }
  0x15   : > { %p821_p2 = scmp.lt.s32.totalorder %s819_s11, %s814_s8 }
  0x16   : > { %p817_p13 = pnand %p816_p12, %p815_p11 }
  0x17   : > { %p822_p3 = por %p821_p2, %p820_p1 }
  0x18   : > { %p818_p0 = pneg %p817_p13 }
  0x1a   : > { %p823_p4 = pnand %p822_p3, %p818_p0 }
  0x1c   : > { %826 = shalt.err (!%p823_p4)
}
  0x1d   : > { %707 = dma.hbm_to_vmem [thread:$0]  (!%p1040_p8), %s172_s5, 1024, %s174_s28, %s1052_s6  }
  0x1e   : > { %p1072_p5 = pnand %p687_p9, %p197_p10  ;;  %s680_s24 = sshll.u32 %s1038_s22, 3 }
  0x1f   : > { %s681_s25 = sshll.u32 %s940_s15, 3  ;;  %s145_s4 = scalar_lea.vmem [#allocation2], %s680_s24 }
  0x20   : > { %s149_s29 = scalar_lea.hbm %s1253_s0, %s681_s25  ;;  %s153_s7 = sshll.u32 %s145_s4, 4  ;;  %s154_s7 = int_to_ptr.vmem [resolvable:$true] %s153_s7 }
  0x21   : > { %s151_s30 = sshll.u32 %s149_s29, 4  ;;  %s142_s8 = scalar_lea.sflag [#allocation3], %s1038_s22  ;;  %s152_s30 = int_to_ptr.hbm [resolvable:$true] %s151_s30 }
  0x22   : > { %s842_s9 = sshra.s32 %s152_s30, 4  ;;  %s849_s10 = scalar_lea.hbm %s1253_s0, 16  ;;  %s843_s9 = int_to_ptr.hbm [resolvable:$true] %s842_s9 }
  0x23   : > { %s844_s28 = scalar_lea.hbm %s843_s9, 8  ;;  %p850_p11 = scmp.lt.s32.totalorder %s843_s9, %s1253_s0 }
  0x24   : > { %p845_p6 = scmp.ne.s32.totalorder %s843_s9, %s844_s28  ;;  %p851_p13 = scmp.lt.s32.totalorder %s849_s10, %s844_s28 }
  0x26   : > { %p847_p9 = pnand %p845_p6, %p816_p12  ;;  %p852_p0 = por %p851_p13, %p850_p11 }
  0x28   : > { %p848_p10 = pneg %p847_p9 }
  0x2a   : > { %p853_p1 = pnand %p852_p0, %p848_p10 }
  0x2c   : > { %856 = shalt.err (!%p853_p1)
}
  0x2d   : > { %704 = dma.hbm_to_vmem [thread:$0]  (!%p1040_p8), %s152_s30, 128, %s154_s7, %s142_s8  }
  0x2e   : > { %s188_s26 = scalar_lea.hbm %s1255_s2, %s681_s25  ;;  %s184_s29 = scalar_lea.vmem [#allocation6], %s680_s24 }
  0x2f   : > { %s190_s27 = sshll.u32 %s188_s26, 4  ;;  %s192_s4 = sshll.u32 %s184_s29, 4  ;;  %s191_s27 = int_to_ptr.hbm [resolvable:$true] %s190_s27  ;;  %s193_s4 = int_to_ptr.vmem [resolvable:$true] %s192_s4 }
  0x30   : > { %s872_s5 = sshra.s32 %s191_s27, 4  ;;  %s879_s30 = scalar_lea.hbm %s1255_s2, 16  ;;  %s873_s5 = int_to_ptr.hbm [resolvable:$true] %s872_s5 }
  0x31   : > { %s874_s9 = scalar_lea.hbm %s873_s5, 8  ;;  %p880_p6 = scmp.lt.s32.totalorder %s873_s5, %s1255_s2 }
  0x32   : > { %p875_p2 = scmp.ne.s32.totalorder %s873_s5, %s874_s9  ;;  %p881_p9 = scmp.lt.s32.totalorder %s879_s30, %s874_s9 }
  0x34   : > { %p877_p3 = pnand %p875_p2, %p816_p12  ;;  %p882_p10 = por %p881_p9, %p880_p6 }
  0x36   : > { %p878_p4 = pneg %p877_p3 }
  0x38   : > { %p883_p11 = pnand %p882_p10, %p878_p4 }
  0x3a   : > { %886 = shalt.err (!%p883_p11)
}
  0x3b   : > { %710 = dma.hbm_to_vmem [thread:$0]  (!%p1040_p8), %s191_s27, 128, %s193_s4, %s1052_s6  }
  0x3c   : > { %201 = sbr.rel (%p1072_p5) target bundleno = 516 (0x204), region = 32  ;;  %s1111_s24 = sand.u32 (!%p1072_p5), 1, %s932_s13  }
  0x3d   : > { %s688_s25 = sshll.u32 (!%p1072_p5), %s1111_s24, 3  ;;  %s204_s10 = scalar_lea.sflag (!%p1072_p5), [#allocation3], %s1111_s24 }
  0x3e   : > { %s207_s11 = scalar_lea.vmem (!%p1072_p5), [#allocation2], %s688_s25 }
  0x41   : > { %919 = dma.done.wait (%p1033_p7), %s204_s10, 128  }
  0x42   : > { %921 = vsyncadd (%p1033_p7), %s204_s10, 4294967168  ;;  %s213_s23 = sand.u32 1, %s1016_s16   ;;  %s689_s6 = sshll.u32 %s1111_s24, 6 }
  0x43   : > { %s214_s19 = scalar_lea.sflag [#allocation5], %s213_s23  ;;  %s1123_s12 = scalar_lea.vmem [#allocation4], %s689_s6 }
  0x44   : > { %923 = dma.done.wait (%p1033_p7), %s214_s19, 1152  }
  0x45   : > { %925 = vsyncadd (%p1033_p7), %s214_s19, 4294966144  ;;  %v942_v0 = vmov 0   ;;  %v943_v1 = vmov 3   ;;  %v944_v2 = vmov 2   ;;  %v1129_v3 = vld [vmem:[%s207_s11] sm:$0xff]  ;;  %v945_v4 = vmov 1  }
  0x46   : > { %779 = vset.pattern.permute.xlu0 %v942_v0  ;;  %782 = vset.pattern.permute.xlu2 %v943_v1  ;;  %v946_v5 = vmov 4   ;;  %v947_v6 = vmov 8   ;;  %v948_v7 = vmov 5   ;;  %v949_v8 = vmov 6   ;;  %v302_v30 = vld [vmem:[%s1123_s12 + $0x8] sm:$0xff]  ;;  %v265_v35 = vld [vmem:[%s1123_s12] sm:$0xff] }
  0x47   : > { %781 = vset.pattern.permute.xlu1 %v944_v2  ;;  %268 = vperm.xlu0 %779, %v1129_v3   ;;  %v950_v9 = vmov 10   ;;  %v951_v10 = vmov 7   ;;  %v952_v11 = vmov 11   ;;  %v953_v12 = vmov 13   ;;  %s971_s21 = smov 64   ;;  %s972_s22 = smov 32  }
  0x48   : > { %293 = vperm.xlu2 %782, %v1129_v3   ;;  %283 = vperm.xlu1 %781, %v1129_v3   ;;  %v954_v13 = vmov 9   ;;  %v955_v14 = vmov 14   ;;  %v956_v15 = vmov 17   ;;  %v957_v16 = vmov 12   ;;  %v339_v43 = vld [vmem:[%s1123_s12 + $0x10] sm:$0xff]  ;;  %s973_s18 = smov 96  }
  0x49   : > { %v958_v17 = vmov 19   ;;  %v959_v18 = vmov 21   ;;  %v960_v19 = vmov 15   ;;  %v961_v20 = vmov 26   ;;  %v376_v50 = vld [vmem:[%s1123_s12 + $0x18] sm:$0xff]  ;;  %v1184_v0 = vld [vmem:[%s1123_s12 + $0x20] sm:$0xff] }
  0x4a   : > { %v962_v21 = vmov 23   ;;  %v963_v22 = vmov 18   ;;  %v964_v23 = vmov 27   ;;  %v965_v24 = vmov 22   ;;  %s227_s26 = scalar_lea.vmem [#allocation6], %s688_s25  ;;  %p260_p7 = scmp.lt.s32.totalorder %s1016_s16, 1 }
  0x4b   : > { %v966_v25 = vmov 30   ;;  %v967_v26 = vmov 25   ;;  %v968_v27 = vmov 16   ;;  %v969_v28 = vmov 29  }
  0x4c   : > { %v970_v31 = vmov 31   ;;  %v974_v58 = vmov 20   ;;  %v975_v1 = vmov 24   ;;  %vm563_vm0 = vcmask 261120   ;;  %s1265_s16 = smov (!%p260_p7, %s1016_s16), 1 }
  0x4d   : > { %s691_s27 = sshll.u32 %s1265_s16, 3  ;;  %vm567_vm1 = vcmask 7168  }
  0x4e   : > { %s263_s5 = scalar_lea.vmem %s1256_s3, %s691_s27 }
  0x4f   : > { %780 = vset.pattern.permute.xlu0 %v945_v4 }
  0x50   : > { %783 = vset.pattern.permute.xlu2 %v946_v5  ;;  %273 = vperm.xlu0 %780, %v1129_v3  }
  0x51   : > { %304 = vperm.xlu2 %783, %v1129_v3   ;;  %787 = vset.pattern.permute.xlu1 %v947_v6 }
  0x52   : > { %341 = vperm.xlu1 %787, %v1129_v3  }
  0x58   : > { %784 = vset.pattern.permute.xlu0 %v948_v7 }
  0x59   : > { %785 = vset.pattern.permute.xlu2 %v949_v8  ;;  %310 = vperm.xlu0 %784, %v1129_v3  }
  0x5a   : > { %320 = vperm.xlu2 %785, %v1129_v3   ;;  %789 = vset.pattern.permute.xlu1 %v950_v9  ;;  %v1192_v9 = vld [vmem:[%s1123_s12 + $0x28] sm:$0xff] }
  0x5b   : > { %357 = vperm.xlu1 %789, %v1129_v3  }
  0x61   : > { %790 = vset.pattern.permute.xlu0 %v952_v11 }
  0x62   : > { %786 = vset.pattern.permute.xlu2 %v951_v10  ;;  %367 = vperm.xlu0 %790, %v1129_v3  }
  0x63   : > { %330 = vperm.xlu2 %786, %v1129_v3   ;;  %792 = vset.pattern.permute.xlu1 %v953_v12 }
  0x64   : > { %384 = vperm.xlu1 %792, %v1129_v3  }
  0x6a   : > { %793 = vset.pattern.permute.xlu0 %v955_v14 }
  0x6b   : > { %788 = vset.pattern.permute.xlu2 %v954_v13  ;;  %394 = vperm.xlu0 %793, %v1129_v3  }
  0x6c   : > { %347 = vperm.xlu2 %788, %v1129_v3   ;;  %795 = vset.pattern.permute.xlu1 %v956_v15 }
  0x6d   : > { %421 = vperm.xlu1 %795, %v1129_v3  }
  0x73   : > { %797 = vset.pattern.permute.xlu0 %v958_v17 }
  0x74   : > { %791 = vset.pattern.permute.xlu2 %v957_v16  ;;  %441 = vperm.xlu0 %797, %v1129_v3  }
  0x75   : > { %378 = vperm.xlu2 %791, %v1129_v3   ;;  %798 = vset.pattern.permute.xlu1 %v959_v18 }
  0x76   : > { %458 = vperm.xlu1 %798, %v1129_v3  }
  0x7c   : > { %802 = vset.pattern.permute.xlu0 %v961_v20  ;;  %v976_v20 = vmov 28  }
  0x7d   : > { %794 = vset.pattern.permute.xlu2 %v960_v19  ;;  %505 = vperm.xlu0 %802, %v1129_v3  }
  0x7e   : > { %404 = vperm.xlu2 %794, %v1129_v3   ;;  %800 = vset.pattern.permute.xlu1 %v962_v21  ;;  %v1204_v21 = vld [vmem:[%s1123_s12 + $0x30] sm:$0xff] }
  0x7f   : > { %478 = vperm.xlu1 %800, %v1129_v3  }
  0x85   : > { %809 = vset.pattern.permute.xlu0 %v975_v1 }
  0x86   : > { %796 = vset.pattern.permute.xlu2 %v963_v22 }
  0x87   : > { %431 = vperm.xlu2 %796, %v1129_v3   ;;  %803 = vset.pattern.permute.xlu1 %v964_v23 }
  0x88   : > { %515 = vperm.xlu1 %803, %v1129_v3  }
  0x8f   : > { %799 = vset.pattern.permute.xlu2 %v965_v24  ;;  %v1209_v24 = vld [vmem:[%s1123_s12 + $0x38] sm:$0xff] }
  0x90   : > { %468 = vperm.xlu2 %799, %v1129_v3   ;;  %805 = vset.pattern.permute.xlu1 %v966_v25 }
  0x91   : > { %542 = vperm.xlu1 %805, %v1129_v3  }
  0x98   : > { %801 = vset.pattern.permute.xlu2 %v967_v26 }
  0x99   : > { %495 = vperm.xlu2 %801, %v1129_v3   ;;  %807 = vset.pattern.permute.xlu1 %v968_v27 }
  0x9a   : > { %415 = vperm.xlu1 %807, %v1129_v3  }
  0xa1   : > { %804 = vset.pattern.permute.xlu2 %v969_v28 }
  0xa2   : > { %v294_v29 = vpop.permute.xlu2 %293  ;;  %532 = vperm.xlu2 %804, %v1129_v3  }
  0xa3   : > { %v296_v49 = vmul.f32 %v294_v29, %v265_v35 }
  0xaa   : > { %806 = vset.pattern.permute.xlu2 %v970_v31 }
  0xab   : > { %v305_v32 = vpop.permute.xlu2 %304  ;;  %552 = vperm.xlu2 %806, %v1129_v3  }
  0xac   : > { %v1162_v33 = vmul.f32 %v305_v32, %v302_v30 }
  0xb3   : > { %808 = vset.pattern.permute.xlu2 %v974_v58 }
  0xb4   : > { %v321_v34 = vpop.permute.xlu2 %320 }
  0xb5   : > { %v323_v63 = vmul.f32 %v321_v34, %v302_v30 }
  0xb9   : > { %v269_v36 = vpop.permute.xlu0 %268 }
  0xba   : > { %v1165_v37 = vmul.f32 %v269_v36, %v265_v35  ;;  %v284_v38 = vpop.permute.xlu1 %283 }
  0xbb   : > { %v286_v39 = vmul.f32 %v284_v38, %v265_v35 }
  0xbd   : > { %v331_v40 = vpop.permute.xlu2 %330  ;;  %288 = vrot.lane.b32.xlu2 %v286_v39, %s971_s21 }
  0xbe   : > { %v333_v41 = vmul.f32 %v331_v40, %v302_v30 }
  0xc0   : > { %335 = vrot.lane.b32.xlu0 %v333_v41, %s972_s22 }
  0xc2   : > { %v274_v42 = vpop.permute.xlu0 %273 }
  0xc3   : > { %v276_v44 = vmul.f32 %v274_v42, %v265_v35 }
  0xc4   : > { %v342_v45 = vpop.permute.xlu1 %341 }
  0xc5   : > { %278 = vrot.lane.b32.xlu1 %v276_v44, %s973_s18  ;;  %v1171_v46 = vmul.f32 %v342_v45, %v339_v43 }
  0xc6   : > { %v348_v47 = vpop.permute.xlu2 %347 }
  0xc7   : > { %v350_v48 = vmul.f32 %v348_v47, %v339_v43 }
  0xc9   : > { %352 = vrot.lane.b32.xlu0 %v350_v48, %s973_s18 }
  0xcb   : > { %v311_v52 = vpop.permute.xlu0 %310 }
  0xcc   : > { %v313_v56 = vmul.f32 %v311_v52, %v302_v30 }
  0xcd   : > { %298 = vrot.lane.b32.xlu1 %v296_v49, %s972_s22  ;;  %v358_v51 = vpop.permute.xlu1 %357 }
  0xce   : > { %v360_v54 = vmul.f32 %v358_v51, %v339_v43 }
  0xcf   : > { %v379_v53 = vpop.permute.xlu2 %378 }
  0xd0   : > { %v1176_v55 = vmul.f32 %v379_v53, %v376_v50  ;;  %362 = vrot.lane.b32.xlu2 %v360_v54, %s971_s21 }
  0xd4   : > { %v368_v62 = vpop.permute.xlu0 %367 }
  0xd5   : > { %315 = vrot.lane.b32.xlu1 %v313_v56, %s973_s18  ;;  %v370_v7 = vmul.f32 %v368_v62, %v339_v43 }
  0xd6   : > { %v385_v57 = vpop.permute.xlu1 %384 }
  0xd7   : > { %v387_v60 = vmul.f32 %v385_v57, %v376_v50 }
  0xd8   : > { %v405_v59 = vpop.permute.xlu2 %404 }
  0xd9   : > { %v407_v61 = vmul.f32 %v405_v59, %v376_v50  ;;  %389 = vrot.lane.b32.xlu2 %v387_v60, %s973_s18 }
  0xdb   : > { %409 = vrot.lane.b32.xlu0 %v407_v61, %s972_s22 }
  0xdd   : > { %325 = vrot.lane.b32.xlu1 %v323_v63, %s971_s21  ;;  %v395_v8 = vpop.permute.xlu0 %394 }
  0xde   : > { %v397_v11 = vmul.f32 %v395_v8, %v376_v50 }
  0xdf   : > { %v422_v2 = vpop.permute.xlu1 %421 }
  0xe0   : > { %v424_v5 = vmul.f32 %v422_v2, %v1184_v0 }
  0xe1   : > { %v432_v4 = vpop.permute.xlu2 %431 }
  0xe2   : > { %v434_v6 = vmul.f32 %v432_v4, %v1184_v0  ;;  %426 = vrot.lane.b32.xlu2 %v424_v5, %s973_s18 }
  0xe4   : > { %436 = vrot.lane.b32.xlu0 %v434_v6, %s971_s21 }
  0xe5   : > { %372 = vrot.lane.b32.xlu1 %v370_v7, %s972_s22 }
  0xe6   : > { %v442_v14 = vpop.permute.xlu0 %441 }
  0xe7   : > { %v444_v15 = vmul.f32 %v442_v14, %v1184_v0 }
  0xe8   : > { %v459_v10 = vpop.permute.xlu1 %458 }
  0xe9   : > { %v461_v12 = vmul.f32 %v459_v10, %v1192_v9 }
  0xea   : > { %v469_v13 = vpop.permute.xlu2 %468  ;;  %452 = vperm.xlu2 %808, %v1129_v3  }
  0xeb   : > { %v471_v23 = vmul.f32 %v469_v13, %v1192_v9 }
  0xec   : > { %463 = vrot.lane.b32.xlu0 %v461_v12, %s973_s18 }
  0xed   : > { %399 = vrot.lane.b32.xlu1 %v397_v11, %s971_s21 }
  0xef   : > { %v506_v19 = vpop.permute.xlu0 %505 }
  0xf0   : > { %v508_v22 = vmul.f32 %v506_v19, %v1204_v21 }
  0xf1   : > { %v479_v16 = vpop.permute.xlu1 %478 }
  0xf2   : > { %v481_v17 = vmul.f32 %v479_v16, %v1192_v9  ;;  %810 = vset.pattern.permute.xlu2 %v976_v20 }
  0xf3   : > { %v496_v18 = vpop.permute.xlu2 %495 }
  0xf4   : > { %489 = vperm.xlu0 %809, %v1129_v3   ;;  %483 = vrot.lane.b32.xlu2 %v481_v17, %s972_s22  ;;  %v498_v27 = vmul.f32 %v496_v18, %v1204_v21 }
  0xf5   : > { %446 = vrot.lane.b32.xlu1 %v444_v15, %s972_s22 }
  0xfa   : > { %v516_v28 = vpop.permute.xlu1 %515 }
  0xfc   : > { %v533_v25 = vpop.permute.xlu2 %532  ;;  %811 = vset.pattern.permute.xlu0 %v970_v31  ;;  %510 = vrot.lane.b32.xlu2 %v508_v22, %s971_s21  ;;  %v518_v31 = vmul.f32 %v516_v28, %v1204_v21 }
  0xfd   : > { %v535_v26 = vmul.f32 %v533_v25, %v1209_v24  ;;  %473 = vrot.lane.b32.xlu1 %v471_v23, %s971_s21 }
  0xff   : > { %537 = vrot.lane.b32.xlu0 %v535_v26, %s973_s18 }
 0x103   : > { %v543_v32 = vpop.permute.xlu1 %542 }
 0x104   : > { %526 = vperm.xlu2 %810, %v1129_v3   ;;  %v545_v34 = vmul.f32 %v543_v32, %v1209_v24 }
 0x105   : > { %500 = vrot.lane.b32.xlu1 %v498_v27, %s973_s18  ;;  %v553_v29 = vpop.permute.xlu2 %552 }
 0x106   : > { %v555_v30 = vmul.f32 %v553_v29, %v1209_v24 }
 0x10c   : > { %557 = vrot.lane.b32.xlu2 %v555_v30, %s972_s22  ;;  %v416_v35 = vpop.permute.xlu1 %415 }
 0x10d   : > { %520 = vrot.lane.b32.xlu1 %v518_v31, %s972_s22  ;;  %v418_v2 = vmul.f32 %v416_v35, %v1184_v0 }
 0x115   : > { %547 = vrot.lane.b32.xlu1 %v545_v34, %s971_s21 }
 0x117   : > { %v289_v38 = vpop.permute.xlu2 %288 }
 0x12a   : > { %v363_v44 = vpop.permute.xlu2 %362 }
 0x132   : > { %v336_v42 = vpop.permute.xlu0 %335 }
 0x133   : > { %v390_v48 = vpop.permute.xlu2 %389 }
 0x137   : > { %v279_v36 = vpop.permute.xlu1 %278 }
 0x138   : > { %v281_v3 = vadd.f32 %v279_v36, %v1165_v37 }
 0x13a   : > { %v291_v39 = vadd.f32 %v289_v38, %v281_v3 }
 0x13b   : > { %v353_v47 = vpop.permute.xlu0 %352 }
 0x13c   : > { %v427_v37 = vpop.permute.xlu2 %426 }
 0x13f   : > { %v299_v40 = vpop.permute.xlu1 %298 }
 0x140   : > { %v301_v41 = vadd.f32 %v299_v40, %v291_v39 }
 0x142   : > { %v308_v43 = vadd.f32 %v1162_v33, %v301_v41 }
 0x144   : > { %v453_v62 = vpop.permute.xlu2 %452 }
 0x147   : > { %v316_v45 = vpop.permute.xlu1 %315 }
 0x148   : > { %v318_v49 = vadd.f32 %v316_v45, %v308_v43 }
 0x14d   : > { %v410_v53 = vpop.permute.xlu0 %409 }
 0x14e   : > { %v484_v11 = vpop.permute.xlu2 %483 }
 0x14f   : > { %v326_v50 = vpop.permute.xlu1 %325 }
 0x150   : > { %v328_v51 = vadd.f32 %v326_v50, %v318_v49 }
 0x152   : > { %v338_v52 = vadd.f32 %v336_v42, %v328_v51 }
 0x154   : > { %v345_v54 = vadd.f32 %v1171_v46, %v338_v52  ;;  %v455_v46 = vmul.f32 %v453_v62, %v1192_v9 }
 0x156   : > { %v355_v56 = vadd.f32 %v353_v47, %v345_v54  ;;  %v437_v61 = vpop.permute.xlu0 %436  ;;  %v511_v17 = vpop.permute.xlu2 %510 }
 0x157   : > { %v373_v57 = vpop.permute.xlu1 %372 }
 0x158   : > { %v365_v58 = vadd.f32 %v363_v44, %v355_v56 }
 0x15a   : > { %v375_v59 = vadd.f32 %v373_v57, %v365_v58 }
 0x15c   : > { %v382_v60 = vadd.f32 %v1176_v55, %v375_v59 }
 0x15e   : > { %v392_v33 = vadd.f32 %v390_v48, %v382_v60  ;;  %v464_v8 = vpop.permute.xlu0 %463  ;;  %v527_v23 = vpop.permute.xlu2 %526 }
 0x15f   : > { %v400_v63 = vpop.permute.xlu1 %399  ;;  %v529_v9 = vmul.f32 %v527_v23, %v1209_v24 }
 0x160   : > { %v402_v1 = vadd.f32 %v400_v63, %v392_v33 }
 0x162   : > { %v412_v4 = vadd.f32 %v410_v53, %v402_v1 }
 0x164   : > { %v419_v5 = vadd.f32 %v418_v2, %v412_v4 }
 0x166   : > { %v429_v6 = vadd.f32 %v427_v37, %v419_v5  ;;  %v490_v16 = vpop.permute.xlu0 %489  ;;  %v558_v32 = vpop.permute.xlu2 %557 }
 0x167   : > { %v447_v7 = vpop.permute.xlu1 %446  ;;  %v492_v0 = vmul.f32 %v490_v16, %v1204_v21  ;;  %v561_v21 = vld [vmem:[%s227_s26] sm:$0xff] }
 0x168   : > { %v439_v10 = vadd.f32 %v437_v61, %v429_v6 }
 0x16a   : > { %v449_v12 = vadd.f32 %v447_v7, %v439_v10 }
 0x16c   : > { %v456_v13 = vadd.f32 %v455_v46, %v449_v12 }
 0x16e   : > { %v466_v14 = vadd.f32 %v464_v8, %v456_v13 }
 0x16f   : > { %v474_v55 = vpop.permute.xlu1 %473 }
 0x170   : > { %v476_v15 = vadd.f32 %v474_v55, %v466_v14 }
 0x171   : > { %v538_v29 = vpop.permute.xlu0 %537 }
 0x172   : > { %v486_v18 = vadd.f32 %v484_v11, %v476_v15 }
 0x174   : > { %v493_v20 = vadd.f32 %v492_v0, %v486_v18 }
 0x177   : > { %v501_v19 = vpop.permute.xlu1 %500 }
 0x178   : > { %v503_v22 = vadd.f32 %v501_v19, %v493_v20 }
 0x17a   : > { %v513_v25 = vadd.f32 %v511_v17, %v503_v22 }
 0x17f   : > { %v521_v26 = vpop.permute.xlu1 %520 }
 0x180   : > { %v523_v27 = vadd.f32 %v521_v26, %v513_v25 }
 0x182   : > { %v530_v28 = vadd.f32 %v529_v9, %v523_v27 }
 0x184   : > { %v540_v30 = vadd.f32 %v538_v29, %v530_v28 }
 0x187   : > { %v548_v31 = vpop.permute.xlu1 %547 }
 0x188   : > { %v550_v34 = vadd.f32 %v548_v31, %v540_v30 }
 0x18a   : > { %v560_v35 = vadd.f32 %v558_v32, %v550_v34 }
 0x18c   : > { %v562_v36 = vmul.f32 %v561_v21, %v560_v35 }
 0x18e   : > { %v564_v3 = vsel %vm563_vm0, %v562_v36, 0.0 }
 0x18f   : > { %565 = vadd.xlane.f32.xlu0 %v564_v3 }
 0x202   : > { %v566_v24 = vpop.xlane.xlu0 %565 }
 0x203   : > { %568 = vst.msk [vmem:[%s263_s5] sm:$0xff] %vm567_vm1, %v566_v24 }
 0x204 PF: > { %p16_p8 = scmp.ge.s32.totalorder %s1019_s17, 4   ;;  %s1260_s12 = smov %s932_s13 }
 0x205   : > { %s1261_s13 = smov %s936_s14  ;;  %s1262_s14 = smov %s1029_s20 }
 0x206   : > { %s1263_s15 = smov %s1019_s17  ;;  %18 = sbr.rel (!%p16_p8) target bundleno = 5 (0x5), region = 96 }
 0x20b   :  { %588 = vsyncpa [#allocation3], 1 }
 0x20c   :  { %590 = vsyncpa [#allocation3 + $0x1], 1 }
 0x20d   :  { %591 = vsyncpa [#allocation5], 1 }
 0x20e   :  { %593 = vsyncpa [#allocation5 + $0x1], 1 }

</bundles_post_ra>
